<compile_context>
chip_gen: v5e
topology: v5e:2x2
jax: 0.10.0
libtpu: 0.0.40
codegen_flags: <defaults>
</compile_context>

<pallas_src>
import functools
import math

import jax
import jax.numpy as jnp
import numpy as np
from jax.experimental import pallas as pl
from jax.experimental.pallas import tpu as pltpu


def mha_kernel(x_ref, wqkv_ref, wo_ref, bqkv_ref, bo_ref,  # inputs
               o_ref,                                       # output
               attn_ref,                                    # VMEM scratch (T, C) f32
               *, n_heads, head_dim):
    T = x_ref.shape[1]
    C = n_heads * head_dim

    # --- fused QKV projection (bf16 operands, f32 accumulate) ---------------
    x16 = x_ref[0].astype(jnp.bfloat16)                     # (T, C)
    qkv = jnp.dot(x16, wqkv_ref[...],                       # (T, 3C) f32
                  preferred_element_type=jnp.float32)
    qkv = qkv + bqkv_ref[...]                               # (1, 3C) broadcast, f32

    # --- causal mask generated in-kernel (cheap VPU iota/compare) -----------
    row = jax.lax.broadcasted_iota(jnp.int32, (T, T), 0)
    col = jax.lax.broadcasted_iota(jnp.int32, (T, T), 1)
    masked = col > row                                      # strictly above diagonal

    scale = 1.0 / math.sqrt(head_dim)
    contract_last = (((1,), (1,)), ((), ()))

    # --- per-head scaled causal attention (static unroll, small n_heads) ----
    for h in range(n_heads):
        q = qkv[:, h * head_dim:(h + 1) * head_dim]                 # (T, hd) f32
        k = qkv[:, C + h * head_dim:C + (h + 1) * head_dim]
        v = qkv[:, 2 * C + h * head_dim:2 * C + (h + 1) * head_dim]

        s = jax.lax.dot_general(q.astype(jnp.bfloat16), k.astype(jnp.bfloat16),
                                contract_last,
                                preferred_element_type=jnp.float32) * scale
        s = jnp.where(masked, -jnp.inf, s)                          # f32 mask

        # softmax kept in f32; normalization folded in after the PV matmul
        m = jnp.max(s, axis=-1, keepdims=True)
        p = jnp.exp(s - m)                                          # unnormalized
        inv_l = pl.reciprocal(jnp.sum(p, axis=-1, keepdims=True), approx=True)

        pv = jnp.dot(p.astype(jnp.bfloat16), v.astype(jnp.bfloat16),
                     preferred_element_type=jnp.float32)            # (T, hd) f32

        # concatenate heads along lanes into the (T, C) scratch
        attn_ref[:, h * head_dim:(h + 1) * head_dim] = pv * inv_l

    # --- single full-contraction output projection + bias, one store --------
    out = jnp.dot(attn_ref[...].astype(jnp.bfloat16), wo_ref[...],
                  preferred_element_type=jnp.float32) + bo_ref[...]
    o_ref[0] = out.astype(o_ref.dtype)


def multi_head_attention(x, params, n_heads):
    """x: (B, T, C) float32.  params: PyTorch-layout Linear weights/biases."""
    B, T, C = x.shape
    hd = C // n_heads

    # Fused QKV weight, pre-transposed so the kernel matmul is x @ Wqkv^T.
    wqkv_t = jnp.concatenate([params["wq"], params["wk"], params["wv"]],
                             axis=0).T                       # (C, 3C)
    bqkv = jnp.concatenate([params["bq"], params["bk"], params["bv"]]
                           ).reshape(1, 3 * C)               # (1, 3C) f32
    wo_t = params["wo"].T                                    # (C, C)
    bo = params["bo"].reshape(1, C)                          # (1, C) f32

    # Weights in bf16: MXU-native operands and half the weight DMA bytes.
    wqkv_bf16 = wqkv_t.astype(jnp.bfloat16)
    wo_bf16 = wo_t.astype(jnp.bfloat16)

    kernel = functools.partial(mha_kernel, n_heads=n_heads, head_dim=hd)

    return pl.pallas_call(
        kernel,
        out_shape=jax.ShapeDtypeStruct((B, T, C), x.dtype),
        grid=(B,),
        in_specs=[
            pl.BlockSpec((1, T, C), lambda b: (b, 0, 0)),    # x (per batch element)
            pl.BlockSpec((C, 3 * C), lambda b: (0, 0)),      # Wqkv^T (fetched once)
            pl.BlockSpec((C, C), lambda b: (0, 0)),          # Wout^T (fetched once)
            pl.BlockSpec((1, 3 * C), lambda b: (0, 0)),      # qkv bias
            pl.BlockSpec((1, C), lambda b: (0, 0)),          # out bias
        ],
        out_specs=pl.BlockSpec((1, T, C), lambda b: (b, 0, 0)),
        scratch_shapes=[pltpu.VMEM((T, C), jnp.float32)],    # concat-head buffer
        compiler_params=pltpu.CompilerParams(
            dimension_semantics=("parallel",),               # megacore over batch
            vmem_limit_bytes=32 * 1024 * 1024),
    )(x, wqkv_bf16, wo_bf16, bqkv, bo)


def mha_reference(x, params, n_heads):
    """Pure-JAX f32 reference mirroring the PyTorch forward (no cache/pad mask)."""
    B, T, C = x.shape
    hd = C // n_heads
    q = x @ params["wq"].T + params["bq"]
    k = x @ params["wk"].T + params["bk"]
    v = x @ params["wv"].T + params["bv"]
    q = q.reshape(B, T, n_heads, hd).transpose(0, 2, 1, 3)
    k = k.reshape(B, T, n_heads, hd).transpose(0, 2, 1, 3)
    v = v.reshape(B, T, n_heads, hd).transpose(0, 2, 1, 3)
    scores = (q @ k.transpose(0, 1, 3, 2)) / math.sqrt(hd)
    mask = jnp.where(jnp.triu(jnp.ones((T, T), jnp.float32), k=1) > 0,
                     jnp.float32(float("-inf")), jnp.float32(0.0))
    scores = scores + mask[None, None]
    w = jax.nn.softmax(scores, axis=-1)
    out = (w @ v).transpose(0, 2, 1, 3).reshape(B, T, C)
    return out @ params["wo"].T + params["bo"]


if __name__ == "__main__":
    # small config consistent with the module: d_model=32, n_heads=4, seq T=8
    B, T, d_model, n_heads = 2, 8, 32, 4

    key = jax.random.PRNGKey(0)
    keys = jax.random.split(key, 9)
    scale = 1.0 / math.sqrt(d_model)
    params = {
        "wq": jax.random.normal(keys[0], (d_model, d_model), jnp.float32) * scale,
        "bq": jax.random.normal(keys[1], (d_model,), jnp.float32) * 0.02,
        "wk": jax.random.normal(keys[2], (d_model, d_model), jnp.float32) * scale,
        "bk": jax.random.normal(keys[3], (d_model,), jnp.float32) * 0.02,
        "wv": jax.random.normal(keys[4], (d_model, d_model), jnp.float32) * scale,
        "bv": jax.random.normal(keys[5], (d_model,), jnp.float32) * 0.02,
        "wo": jax.random.normal(keys[6], (d_model, d_model), jnp.float32) * scale,
        "bo": jax.random.normal(keys[7], (d_model,), jnp.float32) * 0.02,
    }
    x = jax.random.normal(keys[8], (B, T, d_model), jnp.float32)

    out = multi_head_attention(x, params, n_heads)
    out = jax.block_until_ready(out)

    ref = mha_reference(x, params, n_heads)
    # Tolerance sized for bf16 MXU operands (f32 accumulate) vs an f32 reference.
    np.testing.assert_allclose(np.asarray(out), np.asarray(ref),
                               atol=5e-2, rtol=5e-2)

    print("KERNEL_OK")
</pallas_src>

<mosaic_0001>
module attributes {stable_mosaic.version = 11 : i64} {
  func.func @mha_kernel(%arg0: i32, %arg1: memref<1x8x32xf32, #tpu.memory_space<vmem>>, %arg2: memref<32x96xbf16, #tpu.memory_space<vmem>>, %arg3: memref<32x32xbf16, #tpu.memory_space<vmem>>, %arg4: memref<1x96xf32, #tpu.memory_space<vmem>>, %arg5: memref<1x32xf32, #tpu.memory_space<vmem>>, %arg6: memref<1x8x32xf32, #tpu.memory_space<vmem>>, %arg7: memref<8x32xf32, #tpu.memory_space<vmem>>) attributes {dimension_semantics = [#tpu.dimension_semantics<parallel>], iteration_bounds = array<i64: 2>, scalar_prefetch = 0 : i64, scratch_operands = 1 : i64, tpu.core_type = #tpu.core_type<tc>, window_params = [{transform_indices = @transform_0, window_bounds = array<i64: 1, 8, 32>}, {pipeline_mode = #tpu.pipeline_mode<synchronous>, transform_indices = @transform_1, window_bounds = array<i64: 32, 96>}, {pipeline_mode = #tpu.pipeline_mode<synchronous>, transform_indices = @transform_2, window_bounds = array<i64: 32, 32>}, {pipeline_mode = #tpu.pipeline_mode<synchronous>, transform_indices = @transform_3, window_bounds = array<i64: 1, 96>}, {pipeline_mode = #tpu.pipeline_mode<synchronous>, transform_indices = @transform_4, window_bounds = array<i64: 1, 32>}, {transform_indices = @transform_5, window_bounds = array<i64: 1, 8, 32>}]} {
    %c0 = arith.constant 0 : index
    %c0_0 = arith.constant 0 : index
    %c0_1 = arith.constant 0 : index
    %0 = vector.load %arg1[%c0, %c0_0, %c0_1] : memref<1x8x32xf32, #tpu.memory_space<vmem>>, vector<1x8x32xf32>
    %1 = vector.shape_cast %0 : vector<1x8x32xf32> to vector<8x32xf32>
    %2 = arith.truncf %1 : vector<8x32xf32> to vector<8x32xbf16>
    %c0_2 = arith.constant 0 : index
    %c0_3 = arith.constant 0 : index
    %3 = vector.load %arg2[%c0_2, %c0_3] : memref<32x96xbf16, #tpu.memory_space<vmem>>, vector<32x96xbf16>
    %cst = arith.constant dense<0.000000e+00> : vector<8x96xf32>
    %4 = tpu.matmul %2, %3, %cst {dimension_numbers = #tpu.dot_dimension_numbers<[1], [0], [0], [1], [0, 0, 1, 1], [], []>} : vector<8x32xbf16>, vector<32x96xbf16>, vector<8x96xf32> -> vector<8x96xf32>
    %c0_4 = arith.constant 0 : index
    %c0_5 = arith.constant 0 : index
    %5 = vector.load %arg4[%c0_4, %c0_5] : memref<1x96xf32, #tpu.memory_space<vmem>>, vector<1x96xf32>
    %6 = vector.broadcast %5 : vector<1x96xf32> to vector<8x96xf32>
    %7 = arith.addf %4, %6 : vector<8x96xf32>
    %8 = tpu.iota {dimensions = array<i32: 0>} : vector<8x8xi32>
    %9 = tpu.iota {dimensions = array<i32: 1>} : vector<8x8xi32>
    %10 = arith.cmpi sgt, %9, %8 : vector<8x8xi32>
    %11 = vector.extract_strided_slice %7 {offsets = [0, 0], sizes = [8, 8], strides = [1, 1]} : vector<8x96xf32> to vector<8x8xf32>
    %12 = vector.extract_strided_slice %7 {offsets = [0, 32], sizes = [8, 8], strides = [1, 1]} : vector<8x96xf32> to vector<8x8xf32>
    %13 = vector.extract_strided_slice %7 {offsets = [0, 64], sizes = [8, 8], strides = [1, 1]} : vector<8x96xf32> to vector<8x8xf32>
    %14 = arith.truncf %11 : vector<8x8xf32> to vector<8x8xbf16>
    %15 = arith.truncf %12 : vector<8x8xf32> to vector<8x8xbf16>
    %cst_6 = arith.constant dense<0.000000e+00> : vector<8x8xf32>
    %16 = tpu.matmul %14, %15, %cst_6 {dimension_numbers = #tpu.dot_dimension_numbers<[1], [1], [0], [0], [0, 0, 1, 0], [], []>} : vector<8x8xbf16>, vector<8x8xbf16>, vector<8x8xf32> -> vector<8x8xf32>
    %cst_7 = arith.constant 0.353553385 : f32
    %17 = vector.broadcast %cst_7 : f32 to vector<8x8xf32>
    %18 = arith.mulf %16, %17 : vector<8x8xf32>
    %cst_8 = arith.constant 0xFF800000 : f32
    %19 = vector.broadcast %cst_8 : f32 to vector<8x8xf32>
    %20 = arith.select %10, %19, %18 : vector<8x8xi1>, vector<8x8xf32>
    %cst_9 = arith.constant dense<0xFF800000> : vector<8xf32>
    %21 = vector.multi_reduction <maximumf>, %20, %cst_9 [1] : vector<8x8xf32> to vector<8xf32>
    %22 = vector.shape_cast %21 : vector<8xf32> to vector<8x1xf32>
    %23 = vector.broadcast %22 : vector<8x1xf32> to vector<8x8xf32>
    %24 = arith.subf %20, %23 : vector<8x8xf32>
    %25 = math.exp %24 : vector<8x8xf32>
    %cst_10 = arith.constant dense<0.000000e+00> : vector<8xf32>
    %26 = vector.multi_reduction <add>, %25, %cst_10 [1] : vector<8x8xf32> to vector<8xf32>
    %27 = vector.shape_cast %26 : vector<8xf32> to vector<8x1xf32>
    %28 = tpu.reciprocal %27 {approx = true} : vector<8x1xf32> -> vector<8x1xf32>
    %29 = arith.truncf %25 : vector<8x8xf32> to vector<8x8xbf16>
    %30 = arith.truncf %13 : vector<8x8xf32> to vector<8x8xbf16>
    %cst_11 = arith.constant dense<0.000000e+00> : vector<8x8xf32>
    %31 = tpu.matmul %29, %30, %cst_11 {dimension_numbers = #tpu.dot_dimension_numbers<[1], [0], [0], [1], [0, 0, 1, 1], [], []>} : vector<8x8xbf16>, vector<8x8xbf16>, vector<8x8xf32> -> vector<8x8xf32>
    %32 = vector.broadcast %28 : vector<8x1xf32> to vector<8x8xf32>
    %33 = arith.mulf %31, %32 : vector<8x8xf32>
    %c0_12 = arith.constant 0 : index
    %c0_13 = arith.constant 0 : index
    %34 = vector.load %arg7[%c0_12, %c0_13] : memref<8x32xf32, #tpu.memory_space<vmem>>, vector<8x8xf32>
    tpu.vector_store %arg7[%c0_12, %c0_13], %33 {strides = array<i32>} : memref<8x32xf32, #tpu.memory_space<vmem>>, vector<8x8xf32>,
    %35 = vector.extract_strided_slice %7 {offsets = [0, 8], sizes = [8, 8], strides = [1, 1]} : vector<8x96xf32> to vector<8x8xf32>
    %36 = vector.extract_strided_slice %7 {offsets = [0, 40], sizes = [8, 8], strides = [1, 1]} : vector<8x96xf32> to vector<8x8xf32>
    %37 = vector.extract_strided_slice %7 {offsets = [0, 72], sizes = [8, 8], strides = [1, 1]} : vector<8x96xf32> to vector<8x8xf32>
    %38 = arith.truncf %35 : vector<8x8xf32> to vector<8x8xbf16>
    %39 = arith.truncf %36 : vector<8x8xf32> to vector<8x8xbf16>
    %cst_14 = arith.constant dense<0.000000e+00> : vector<8x8xf32>
    %40 = tpu.matmul %38, %39, %cst_14 {dimension_numbers = #tpu.dot_dimension_numbers<[1], [1], [0], [0], [0, 0, 1, 0], [], []>} : vector<8x8xbf16>, vector<8x8xbf16>, vector<8x8xf32> -> vector<8x8xf32>
    %cst_15 = arith.constant 0.353553385 : f32
    %41 = vector.broadcast %cst_15 : f32 to vector<8x8xf32>
    %42 = arith.mulf %40, %41 : vector<8x8xf32>
    %cst_16 = arith.constant 0xFF800000 : f32
    %43 = vector.broadcast %cst_16 : f32 to vector<8x8xf32>
    %44 = arith.select %10, %43, %42 : vector<8x8xi1>, vector<8x8xf32>
    %cst_17 = arith.constant dense<0xFF800000> : vector<8xf32>
    %45 = vector.multi_reduction <maximumf>, %44, %cst_17 [1] : vector<8x8xf32> to vector<8xf32>
    %46 = vector.shape_cast %45 : vector<8xf32> to vector<8x1xf32>
    %47 = vector.broadcast %46 : vector<8x1xf32> to vector<8x8xf32>
    %48 = arith.subf %44, %47 : vector<8x8xf32>
    %49 = math.exp %48 : vector<8x8xf32>
    %cst_18 = arith.constant dense<0.000000e+00> : vector<8xf32>
    %50 = vector.multi_reduction <add>, %49, %cst_18 [1] : vector<8x8xf32> to vector<8xf32>
    %51 = vector.shape_cast %50 : vector<8xf32> to vector<8x1xf32>
    %52 = tpu.reciprocal %51 {approx = true} : vector<8x1xf32> -> vector<8x1xf32>
    %53 = arith.truncf %49 : vector<8x8xf32> to vector<8x8xbf16>
    %54 = arith.truncf %37 : vector<8x8xf32> to vector<8x8xbf16>
    %cst_19 = arith.constant dense<0.000000e+00> : vector<8x8xf32>
    %55 = tpu.matmul %53, %54, %cst_19 {dimension_numbers = #tpu.dot_dimension_numbers<[1], [0], [0], [1], [0, 0, 1, 1], [], []>} : vector<8x8xbf16>, vector<8x8xbf16>, vector<8x8xf32> -> vector<8x8xf32>
    %56 = vector.broadcast %52 : vector<8x1xf32> to vector<8x8xf32>
    %57 = arith.mulf %55, %56 : vector<8x8xf32>
    %c0_20 = arith.constant 0 : index
    %c8 = arith.constant 8 : index
    %58 = vector.load %arg7[%c0_20, %c8] : memref<8x32xf32, #tpu.memory_space<vmem>>, vector<8x8xf32>
    tpu.vector_store %arg7[%c0_20, %c8], %57 {strides = array<i32>} : memref<8x32xf32, #tpu.memory_space<vmem>>, vector<8x8xf32>,
    %59 = vector.extract_strided_slice %7 {offsets = [0, 16], sizes = [8, 8], strides = [1, 1]} : vector<8x96xf32> to vector<8x8xf32>
    %60 = vector.extract_strided_slice %7 {offsets = [0, 48], sizes = [8, 8], strides = [1, 1]} : vector<8x96xf32> to vector<8x8xf32>
    %61 = vector.extract_strided_slice %7 {offsets = [0, 80], sizes = [8, 8], strides = [1, 1]} : vector<8x96xf32> to vector<8x8xf32>
    %62 = arith.truncf %59 : vector<8x8xf32> to vector<8x8xbf16>
    %63 = arith.truncf %60 : vector<8x8xf32> to vector<8x8xbf16>
    %cst_21 = arith.constant dense<0.000000e+00> : vector<8x8xf32>
    %64 = tpu.matmul %62, %63, %cst_21 {dimension_numbers = #tpu.dot_dimension_numbers<[1], [1], [0], [0], [0, 0, 1, 0], [], []>} : vector<8x8xbf16>, vector<8x8xbf16>, vector<8x8xf32> -> vector<8x8xf32>
    %cst_22 = arith.constant 0.353553385 : f32
    %65 = vector.broadcast %cst_22 : f32 to vector<8x8xf32>
    %66 = arith.mulf %64, %65 : vector<8x8xf32>
    %cst_23 = arith.constant 0xFF800000 : f32
    %67 = vector.broadcast %cst_23 : f32 to vector<8x8xf32>
    %68 = arith.select %10, %67, %66 : vector<8x8xi1>, vector<8x8xf32>
    %cst_24 = arith.constant dense<0xFF800000> : vector<8xf32>
    %69 = vector.multi_reduction <maximumf>, %68, %cst_24 [1] : vector<8x8xf32> to vector<8xf32>
    %70 = vector.shape_cast %69 : vector<8xf32> to vector<8x1xf32>
    %71 = vector.broadcast %70 : vector<8x1xf32> to vector<8x8xf32>
    %72 = arith.subf %68, %71 : vector<8x8xf32>
    %73 = math.exp %72 : vector<8x8xf32>
    %cst_25 = arith.constant dense<0.000000e+00> : vector<8xf32>
    %74 = vector.multi_reduction <add>, %73, %cst_25 [1] : vector<8x8xf32> to vector<8xf32>
    %75 = vector.shape_cast %74 : vector<8xf32> to vector<8x1xf32>
    %76 = tpu.reciprocal %75 {approx = true} : vector<8x1xf32> -> vector<8x1xf32>
    %77 = arith.truncf %73 : vector<8x8xf32> to vector<8x8xbf16>
    %78 = arith.truncf %61 : vector<8x8xf32> to vector<8x8xbf16>
    %cst_26 = arith.constant dense<0.000000e+00> : vector<8x8xf32>
    %79 = tpu.matmul %77, %78, %cst_26 {dimension_numbers = #tpu.dot_dimension_numbers<[1], [0], [0], [1], [0, 0, 1, 1], [], []>} : vector<8x8xbf16>, vector<8x8xbf16>, vector<8x8xf32> -> vector<8x8xf32>
    %80 = vector.broadcast %76 : vector<8x1xf32> to vector<8x8xf32>
    %81 = arith.mulf %79, %80 : vector<8x8xf32>
    %c0_27 = arith.constant 0 : index
    %c16 = arith.constant 16 : index
    %82 = vector.load %arg7[%c0_27, %c16] : memref<8x32xf32, #tpu.memory_space<vmem>>, vector<8x8xf32>
    tpu.vector_store %arg7[%c0_27, %c16], %81 {strides = array<i32>} : memref<8x32xf32, #tpu.memory_space<vmem>>, vector<8x8xf32>,
    %83 = vector.extract_strided_slice %7 {offsets = [0, 24], sizes = [8, 8], strides = [1, 1]} : vector<8x96xf32> to vector<8x8xf32>
    %84 = vector.extract_strided_slice %7 {offsets = [0, 56], sizes = [8, 8], strides = [1, 1]} : vector<8x96xf32> to vector<8x8xf32>
    %85 = vector.extract_strided_slice %7 {offsets = [0, 88], sizes = [8, 8], strides = [1, 1]} : vector<8x96xf32> to vector<8x8xf32>
    %86 = arith.truncf %83 : vector<8x8xf32> to vector<8x8xbf16>
    %87 = arith.truncf %84 : vector<8x8xf32> to vector<8x8xbf16>
    %cst_28 = arith.constant dense<0.000000e+00> : vector<8x8xf32>
    %88 = tpu.matmul %86, %87, %cst_28 {dimension_numbers = #tpu.dot_dimension_numbers<[1], [1], [0], [0], [0, 0, 1, 0], [], []>} : vector<8x8xbf16>, vector<8x8xbf16>, vector<8x8xf32> -> vector<8x8xf32>
    %cst_29 = arith.constant 0.353553385 : f32
    %89 = vector.broadcast %cst_29 : f32 to vector<8x8xf32>
    %90 = arith.mulf %88, %89 : vector<8x8xf32>
    %cst_30 = arith.constant 0xFF800000 : f32
    %91 = vector.broadcast %cst_30 : f32 to vector<8x8xf32>
    %92 = arith.select %10, %91, %90 : vector<8x8xi1>, vector<8x8xf32>
    %cst_31 = arith.constant dense<0xFF800000> : vector<8xf32>
    %93 = vector.multi_reduction <maximumf>, %92, %cst_31 [1] : vector<8x8xf32> to vector<8xf32>
    %94 = vector.shape_cast %93 : vector<8xf32> to vector<8x1xf32>
    %95 = vector.broadcast %94 : vector<8x1xf32> to vector<8x8xf32>
    %96 = arith.subf %92, %95 : vector<8x8xf32>
    %97 = math.exp %96 : vector<8x8xf32>
    %cst_32 = arith.constant dense<0.000000e+00> : vector<8xf32>
    %98 = vector.multi_reduction <add>, %97, %cst_32 [1] : vector<8x8xf32> to vector<8xf32>
    %99 = vector.shape_cast %98 : vector<8xf32> to vector<8x1xf32>
    %100 = tpu.reciprocal %99 {approx = true} : vector<8x1xf32> -> vector<8x1xf32>
    %101 = arith.truncf %97 : vector<8x8xf32> to vector<8x8xbf16>
    %102 = arith.truncf %85 : vector<8x8xf32> to vector<8x8xbf16>
    %cst_33 = arith.constant dense<0.000000e+00> : vector<8x8xf32>
    %103 = tpu.matmul %101, %102, %cst_33 {dimension_numbers = #tpu.dot_dimension_numbers<[1], [0], [0], [1], [0, 0, 1, 1], [], []>} : vector<8x8xbf16>, vector<8x8xbf16>, vector<8x8xf32> -> vector<8x8xf32>
    %104 = vector.broadcast %100 : vector<8x1xf32> to vector<8x8xf32>
    %105 = arith.mulf %103, %104 : vector<8x8xf32>
    %c0_34 = arith.constant 0 : index
    %c24 = arith.constant 24 : index
    %106 = vector.load %arg7[%c0_34, %c24] : memref<8x32xf32, #tpu.memory_space<vmem>>, vector<8x8xf32>
    tpu.vector_store %arg7[%c0_34, %c24], %105 {strides = array<i32>} : memref<8x32xf32, #tpu.memory_space<vmem>>, vector<8x8xf32>,
    %c0_35 = arith.constant 0 : index
    %c0_36 = arith.constant 0 : index
    %107 = vector.load %arg7[%c0_35, %c0_36] : memref<8x32xf32, #tpu.memory_space<vmem>>, vector<8x32xf32>
    %108 = arith.truncf %107 : vector<8x32xf32> to vector<8x32xbf16>
    %c0_37 = arith.constant 0 : index
    %c0_38 = arith.constant 0 : index
    %109 = vector.load %arg3[%c0_37, %c0_38] : memref<32x32xbf16, #tpu.memory_space<vmem>>, vector<32x32xbf16>
    %cst_39 = arith.constant dense<0.000000e+00> : vector<8x32xf32>
    %110 = tpu.matmul %108, %109, %cst_39 {dimension_numbers = #tpu.dot_dimension_numbers<[1], [0], [0], [1], [0, 0, 1, 1], [], []>} : vector<8x32xbf16>, vector<32x32xbf16>, vector<8x32xf32> -> vector<8x32xf32>
    %c0_40 = arith.constant 0 : index
    %c0_41 = arith.constant 0 : index
    %111 = vector.load %arg5[%c0_40, %c0_41] : memref<1x32xf32, #tpu.memory_space<vmem>>, vector<1x32xf32>
    %112 = vector.broadcast %111 : vector<1x32xf32> to vector<8x32xf32>
    %113 = arith.addf %110, %112 : vector<8x32xf32>
    %c0_42 = arith.constant 0 : index
    %c0_43 = arith.constant 0 : index
    %c0_44 = arith.constant 0 : index
    %114 = vector.load %arg6[%c0_42, %c0_43, %c0_44] : memref<1x8x32xf32, #tpu.memory_space<vmem>>, vector<1x8x32xf32>
    %115 = vector.shape_cast %114 : vector<1x8x32xf32> to vector<8x32xf32>
    %116 = vector.shape_cast %113 : vector<8x32xf32> to vector<1x8x32xf32>
    tpu.vector_store %arg6[%c0_42, %c0_43, %c0_44], %116 {strides = array<i32>} : memref<1x8x32xf32, #tpu.memory_space<vmem>>, vector<1x8x32xf32>,
    return
  }
  func.func @transform_0(%arg0: i32) -> (i32, i32, i32) {
    %c0_i32 = arith.constant 0 : i32
    %c0_i32_0 = arith.constant 0 : i32
    %c0_i32_1 = arith.constant 0 : i32
    return %arg0, %c0_i32, %c0_i32_0 : i32, i32, i32
  }
  func.func @transform_1(%arg0: i32) -> (i32, i32) {
    %c0_i32 = arith.constant 0 : i32
    %c0_i32_0 = arith.constant 0 : i32
    %c0_i32_1 = arith.constant 0 : i32
    return %c0_i32, %c0_i32_0 : i32, i32
  }
  func.func @transform_2(%arg0: i32) -> (i32, i32) {
    %c0_i32 = arith.constant 0 : i32
    %c0_i32_0 = arith.constant 0 : i32
    %c0_i32_1 = arith.constant 0 : i32
    return %c0_i32, %c0_i32_0 : i32, i32
  }
  func.func @transform_3(%arg0: i32) -> (i32, i32) {
    %c0_i32 = arith.constant 0 : i32
    %c0_i32_0 = arith.constant 0 : i32
    %c0_i32_1 = arith.constant 0 : i32
    return %c0_i32, %c0_i32_0 : i32, i32
  }
  func.func @transform_4(%arg0: i32) -> (i32, i32) {
    %c0_i32 = arith.constant 0 : i32
    %c0_i32_0 = arith.constant 0 : i32
    %c0_i32_1 = arith.constant 0 : i32
    return %c0_i32, %c0_i32_0 : i32, i32
  }
  func.func @transform_5(%arg0: i32) -> (i32, i32, i32) {
    %c0_i32 = arith.constant 0 : i32
    %c0_i32_0 = arith.constant 0 : i32
    %c0_i32_1 = arith.constant 0 : i32
    return %arg0, %c0_i32, %c0_i32_0 : i32, i32, i32
  }
}

</mosaic_0001>

<bundles_post_ra>
// kernel: tpu_custom_call.1
= control target key start
LH: loop header
LB: loop body
LE: loop exit
PB: predicated region body
PF: predicated region fallthrough
CT: control target
= control target key end

     0   :  { %10 = vsyncpa [#allocation4], 0  ;;  %s1275_s0 = inlined_call_operand.hbm [shape: f32[2,8,32], index: 0, kind: input, shape index: {}]   ;;  %s1276_s1 = inlined_call_operand.hbm [shape: bf16[32,96], index: 1, kind: input, shape index: {}]   ;;  %s1277_s2 = inlined_call_operand.hbm [shape: bf16[32,32], index: 2, kind: input, shape index: {}]   ;;  %s1278_s3 = inlined_call_operand.vmem [shape: f32[1,96], index: 3, kind: input, shape index: {}]   ;;  %s1279_s4 = inlined_call_operand.vmem [shape: f32[1,32], index: 4, kind: input, shape index: {}]   ;;  %s1280_s5 = inlined_call_operand.hbm [shape: f32[2,8,32], index: 5, kind: output, shape index: {}]  }
   0x1   :  { %12 = vsyncpa [#allocation4 + $0x1], 0 }
   0x2   :  { %13 = vsyncpa [#allocation7], 0 }
   0x3   :  { %14 = vsyncpa [#allocation5], 0 }
   0x4   :  { %16 = vsyncpa [#allocation5 + $0x1], 0  ;;  %s1074_s18 = smov 0   ;;  %s1076_s19 = smov 0  }
   0x5   :  { %s1078_s20 = smov 0   ;;  %s1080_s21 = smov 0  }
   0x6 LB: > { %s174_s24 = sshll.u32 %s1276_s1, 4  ;;  %s1098_s25 = sadd.s32 4294967295, %s1024_s21   ;;  %s1024_s21 = sphi %s1080_s21, %s1291_s21   ;;  %s1020_s20 = sphi %s1078_s20, %s1290_s20   ;;  %s1016_s19 = sphi %s1076_s19, %s1289_s19   ;;  %s1012_s18 = sphi %s1074_s18, %s1288_s18   ;;  %s175_s24 = int_to_ptr.hbm [resolvable:$true] %s174_s24 }
   0x7   : > { %p718_p0 = scmp.ge.s32.totalorder %s1024_s21, 1  ;;  %p43_p1 = scmp.eq.s32.totalorder %s1098_s25, 0 }
   0x8   : > { %p163_p2 = scmp.lt.s32.totalorder %s1024_s21, 3  ;;  %s1026_s27 = smov [#allocation6]  }
   0x9   : > { %s176_s28 = sshll.u32 %s1026_s27, 4  ;;  %s188_s6 = sshll.u32 %s1277_s2, 4  ;;  %s177_s28 = int_to_ptr.vmem [resolvable:$true] %s176_s28  ;;  %s189_s6 = int_to_ptr.hbm [resolvable:$true] %s188_s6 }
   0xa   : > { %p1103_p3 = pnand %p718_p0, %p163_p2  ;;  %s1027_s7 = smov [#allocation8]  }
   0xb   : > { %s190_s8 = sshll.u32 %s1027_s7, 4  ;;  %s1028_s9 = smov 64   ;;  %s191_s8 = int_to_ptr.vmem [resolvable:$true] %s190_s8 }
   0xc   : > { %p775_p4 = pneg %p1103_p3  ;;  %s1029_s10 = smov 4  }
   0xd   : > { %s717_s11 = sadd.s32 4294967294, %s1024_s21   ;;  %s1117_s12 = sadd.s32 1, %s1024_s21  }
   0xe   : > { %p776_p6 = pnand %p775_p4, %p43_p1  ;;  %s26_s13 = ssub.s32 %s1024_s21, %s1117_s12 }
   0xf   : > { %s29_s14 = sadd.s32 1, %s1020_s20  ;;  %p27_p7 = scmp.eq.s32.totalorder %s26_s13, 0 }
  0x10   : > { %778 = dma.hbm_to_vmem [thread:$0]  (!%p776_p6), %s175_s24, 256, %s177_s28, [#allocation7], %s1028_s9, %s1028_s9, %s1029_s10  }
  0x11   : > { %781 = dma.hbm_to_vmem [thread:$0]  (!%p776_p6), %s189_s6, 256, %s191_s8, [#allocation7], %s1028_s9, %s1028_s9, %s1029_s10  }
  0x12   : > { %p36_p8 = scmp.ne.s32.totalorder %s1020_s20, %s1016_s19  ;;  %p37_p9 = scmp.eq.s32.totalorder %s1024_s21, 0 }
  0x13   : > { %p42_p10 = scmp.ne.s32.totalorder %s1016_s19, %s1012_s18  ;;  %p150_p13 = scmp.eq.s32.totalorder %s1098_s25, 1 }
  0x14   : > { %s1128_s15 = scalar_select %p27_p7, %s1020_s20, %s29_s14  }
  0x15   : > { %p1130_p11 = por %p37_p9, %p36_p8  ;;  %p1136_p12 = por %p43_p1, %p42_p10 }
  0x16   : > { %p156_p0 = scmp.eq.s32.totalorder %s717_s11, 1  ;;  %p792_p2 = scmp.lt.s32.totalorder %s1024_s21, 2 }
  0x17   : > { %s210_s22 = sand.u32 1, %s1020_s20   ;;  %p1143_p4 = por %p150_p13, %p36_p8 }
  0x18   : > { %p1147_p6 = por %p156_p0, %p42_p10  ;;  %s722_s27 = sshll.u32 %s210_s22, 3 }
  0x19   : > { %s723_s28 = sshll.u32 %s1024_s21, 3  ;;  %s214_s7 = scalar_lea.vmem [#allocation3], %s722_s27 }
  0x1a   : > { %s218_s6 = scalar_lea.hbm %s1275_s0, %s723_s28  ;;  %s222_s8 = sshll.u32 %s214_s7, 4  ;;  %s223_s8 = int_to_ptr.vmem [resolvable:$true] %s222_s8 }
  0x1b   : > { %s220_s9 = sshll.u32 %s218_s6, 4  ;;  %p1157_p7 = pnand %p792_p2, %p1130_p11  ;;  %s221_s9 = int_to_ptr.hbm [resolvable:$true] %s220_s9 }
  0x1c   : > { %s211_s11 = scalar_lea.sflag [#allocation4], %s210_s22  ;;  %s924_s13 = sshra.s32 %s221_s9, 4  ;;  %s925_s13 = int_to_ptr.hbm [resolvable:$true] %s924_s13 }
  0x1d   : > { %s926_s14 = scalar_lea.hbm %s925_s13, 8  ;;  %p928_p9 = pneg %p1157_p7 }
  0x1e   : > { %p927_p8 = scmp.ne.s32.totalorder %s925_s13, %s926_s14  ;;  %s931_s29 = scalar_lea.hbm %s1275_s0, 16 }
  0x1f   : > { %p932_p11 = scmp.lt.s32.totalorder %s925_s13, %s1275_s0  ;;  %p933_p0 = scmp.lt.s32.totalorder %s931_s29, %s926_s14 }
  0x20   : > { %p929_p10 = pnand %p928_p9, %p927_p8 }
  0x21   : > { %p934_p2 = por %p933_p0, %p932_p11 }
  0x22   : > { %p930_p13 = pneg %p929_p10 }
  0x24   : > { %p935_p5 = pnand %p934_p2, %p930_p13 }
  0x26   : > { %938 = shalt.err (!%p935_p5)
}
  0x27   : > { %785 = dma.hbm_to_vmem [thread:$0]  (!%p1157_p7), %s221_s9, 128, %s223_s8, %s211_s11  }
  0x28   : > { %231 = sbr.rel (%p1103_p3) target bundleno = 994 (0x3e2), region = 40  ;;  %s1174_s22 = sand.u32 (!%p1103_p3), 1, %s1016_s19  }
  0x29   : > { %s725_s6 = sshll.u32 (!%p1103_p3), %s1174_s22, 3  ;;  %s234_s7 = scalar_lea.sflag (!%p1103_p3), [#allocation4], %s1174_s22 }
  0x2a   : > { %s237_s13 = scalar_lea.vmem (!%p1103_p3), [#allocation3], %s725_s6 }
  0x2d   : > { %999 = dma.done.wait (%p1136_p12), %s234_s7, 128  }
  0x2e   : > { %1001 = vsyncadd (%p1136_p12), %s234_s7, 4294967168 }
  0x2f   : > { %1003 = dma.done.wait (%p43_p1), [#allocation7], 512  }
  0x30   : > { %1005 = vsyncadd (%p43_p1), [#allocation7], 4294966784  ;;  %v760_v0 = vld [vmem:[#allocation6 + $0x8] sm:$0xff]  ;;  %v759_v1 = vld [vmem:[#allocation6] sm:$0xff]  ;;  %vm298_vm0 = vcmask 261120   ;;  %s1030_s17 = smov 104   ;;  %v315_v24 = vlaneseq }
  0x31   : > { %308 = vmatpush.bf16.msra.mxu0 %v760_v0  ;;  %v276_v2 = vld [vmem:[%s237_s13] sm:$0xff]  ;;  %v846_v4 = vld [vmem:[%s1278_s3] ss:$0 sm:$0xff]  ;;  %s1031_s9 = smov 120   ;;  %s1032_s10 = smov 96   ;;  %vm324_vm1 = vcmask 64512  }
  0x32   : > { %v277_v3 = vpack.c.bf16 %v276_v2, %v276_v2  ;;  %s1033_s11 = smov 80   ;;  %s1034_s14 = smov 72   ;;  %vm362_vm2 = vcmask 1043456   ;;  %v316_v25 = vshrl.u32 %v315_v24, 7  ;;  %v318_v26 = vand.u32 127, %v315_v24 }
  0x33   : > { %s1035_s27 = smov 88   ;;  %s1036_s28 = smov 64   ;;  %vm443_vm4 = vcmask 130112   ;;  %vm507_vm5 = vcmask 195712   ;;  %vm571_vm6 = vcmask 261312  }
  0x34   : > { %s1037_s29 = smov 112   ;;  %s1038_s30 = smov 56   ;;  %vm319_vm3 = vcmp.gt.s32.totalorder %v318_v26, %v316_v25 }
  0x35   : > { %309 = vmatpush.bf16.msra.mxu0 %v759_v1  ;;  %s1039_s16 = smov 48   ;;  %s1040_s7 = smov 40  }
  0x36   : > { %s1041_s13 = smov 8   ;;  %s1042_s26 = smov 16  }
  0x37   : > { %s1043_s8 = smov 24  }
  0x38   : > { %737 = vmatmul.msk.bf16.vlgmr.msra.gmra.mxu0 %vm298_vm0, %v277_v3 }
  0xb5   : > { %v311_v5 = vpop.f32.mrf.mxu0 }
  0xb6   : > { %v312_v6 = vadd.f32 %v846_v4, %v311_v5 }
  0xb8   : > { %v1192_v7 = vpack.c.bf16 %v312_v6, %v312_v6 }
  0xba   : > { %509 = vrot.lane.b32.xlu2 %v1192_v7, %s1030_s17  ;;  %381 = vrot.lane.b32.xlu1 %v1192_v7, %s1031_s9  ;;  %s756_s17 = sshll.u32 %s1098_s25, 3  ;;  %s613_s25 = scalar_lea.sflag [#allocation5], %s1174_s22 }
  0xbb   : > { %322 = vrot.lane.b32.xlu0 %v1192_v7, %s1032_s10 }
  0xbd   : > { %v313_v8 = vpop.f32.mrf.mxu0 }
  0xc2   : > { %447 = vrot.lane.b32.xlu2 %v1192_v7, %s1033_s11  ;;  %511 = vrot.lane.b32.xlu1 %v1192_v7, %s1034_s14  ;;  %s623_s11 = scalar_lea.hbm %s1280_s5, %s756_s17 }
  0xc3   : > { %383 = vrot.lane.b32.xlu0 %v1192_v7, %s1035_s27 }
  0xca   : > { %357 = vrot.lane.b32.xlu2 %v1192_v7, %s1036_s28  ;;  %s274_s28 = scalar_lea.vmem [#allocation9], %s725_s6  ;;  %s974_s6 = scalar_lea.hbm %s1280_s5, 16 }
  0xcb   : > { %445 = vrot.lane.b32.xlu0 %v1192_v7, %s1037_s29  ;;  %s625_s29 = sshll.u32 %s274_s28, 4  ;;  %s626_s29 = int_to_ptr.vmem [resolvable:$true] %s625_s29 }
  0xd2   : > { %417 = vrot.lane.b32.xlu2 %v1192_v7, %s1038_s30  ;;  %s627_s30 = sshll.u32 %s623_s11, 4  ;;  %s628_s30 = int_to_ptr.hbm [resolvable:$true] %s627_s30 }
 0x114   : > { %v510_v9 = vpop.permute.xlu2 %509 }
 0x11c   : > { %v448_v10 = vpop.permute.xlu2 %447 }
 0x11d   : > { %v453_v11 = vsel %vm324_vm1, %v448_v10, 0 }
 0x11e   : > { %462 = vmatpush.bf16.xpose.msrb.mxu0 %v453_v11 }
 0x124   : > { %v358_v12 = vpop.permute.xlu2 %357 }
 0x125   : > { %v364_v13 = vsel %vm362_vm2, %v358_v12, 0 }
 0x126   : > { %373 = vmatpush.bf16.msra.mxu2 %v364_v13 }
 0x12c   : > { %v418_v14 = vpop.permute.xlu2 %417  ;;  %v382_v15 = vpop.permute.xlu1 %381 }
 0x12d   : > { %v323_v16 = vpop.permute.xlu0 %322  ;;  %v423_v17 = vsel %vm362_vm2, %v418_v14, 0 }
 0x12e   : > { %v329_v18 = vsel %vm324_vm1, %v323_v16, 0  ;;  %432 = vmatpush.bf16.msrb.mxu2 %v423_v17 }
 0x12f   : > { %338 = vmatpush.bf16.xpose.msra.mxu1 %v329_v18 }
 0x134   : > { %v512_v19 = vpop.permute.xlu1 %511 }
 0x135   : > { %v384_v20 = vpop.permute.xlu0 %383  ;;  %v517_v21 = vsel %vm324_vm1, %v512_v19, 0 }
 0x136   : > { %738 = vmatmul.msk.bf16.vlgmr.msra.gmra.mxu1 %vm324_vm1, %v1192_v7  ;;  %v389_v22 = vsel %vm324_vm1, %v384_v20, 0 }
 0x137   : > { %398 = vmatpush.bf16.xpose.msra.mxu3 %v389_v22 }
 0x13d   : > { %v446_v23 = vpop.permute.xlu0 %445 }
 0x13e   : > { %740 = vmatmul.msk.bf16.vlgmr.msra.gmra.mxu3 %vm324_vm1, %v382_v15  ;;  %742 = vmatmul.msk.bf16.vlgmr.msrb.gmra.mxu0 %vm324_vm1, %v446_v23 }
 0x13f   : > { %526 = vmatpush.bf16.xpose.msrb.mxu3 %v517_v21 }
 0x14e   : > { %744 = vmatmul.msk.bf16.vlgmr.msrb.gmra.mxu3 %vm324_vm1, %v510_v9 }
 0x1b3   : > { %v340_v27 = vpop.f32.mrf.mxu1 }
 0x1b4   : > { %v344_v28 = vmul.f32 0.35355338, %v340_v27 }
 0x1b6   : > { %v345_v29 = vsel %vm319_vm3, -inf, %v344_v28 }
 0x1b7   : > { %v346_v30 = vsel %vm324_vm1, %v345_v29, -inf }
 0x1b8   : > { %347 = vmax.xlane.f32.xlu1 %v346_v30 }
 0x1bb   : > { %v342_v31 = vpop.f32.mrf.mxu1  ;;  %v464_v32 = vpop.f32.mrf.mxu0 }
 0x1bc   : > { %v468_v33 = vmul.f32 0.35355338, %v464_v32  ;;  %v762_v31 = vld [vmem:[#allocation8 + $0x8] sm:$0xff]  ;;  %v761_v32 = vld [vmem:[#allocation8] sm:$0xff] }
 0x1bd   : > { %604 = vmatpush.bf16.msra.mxu0 %v762_v31 }
 0x1be   : > { %v469_v34 = vsel %vm319_vm3, -inf, %v468_v33 }
 0x1bf   : > { %v470_v35 = vsel %vm324_vm1, %v469_v34, -inf }
 0x1c0   : > { %471 = vmax.xlane.f32.xlu1 %v470_v35 }
 0x1c1   : > { %v400_v36 = vpop.f32.mrf.mxu3  ;;  %605 = vmatpush.bf16.msra.mxu0 %v761_v32 }
 0x1c2   : > { %v404_v37 = vmul.f32 0.35355338, %v400_v36 }
 0x1c3   : > { %v466_v38 = vpop.f32.mrf.mxu0 }
 0x1c4   : > { %v405_v39 = vsel %vm319_vm3, -inf, %v404_v37  ;;  %v847_v38 = vld [vmem:[%s1279_s4] ss:$0 sm:$0xff] }
 0x1c5   : > { %v406_v40 = vsel %vm324_vm1, %v405_v39, -inf }
 0x1c6   : > { %407 = vmax.xlane.f32.xlu0 %v406_v40 }
 0x1c9   : > { %v402_v41 = vpop.f32.mrf.mxu3 }
 0x1d1   : > { %v528_v42 = vpop.f32.mrf.mxu3 }
 0x1d2   : > { %v532_v43 = vmul.f32 0.35355338, %v528_v42 }
 0x1d4   : > { %v533_v44 = vsel %vm319_vm3, -inf, %v532_v43 }
 0x1d5   : > { %v534_v45 = vsel %vm324_vm1, %v533_v44, -inf }
 0x1d6   : > { %535 = vmax.xlane.f32.xlu2 %v534_v45 }
 0x1d9   : > { %v530_v46 = vpop.f32.mrf.mxu3  ;;  %481 = vrot.lane.b32.xlu1 %v1192_v7, %s1039_s16  ;;  %s968_s16 = sshra.s32 %s628_s30, 4  ;;  %s969_s16 = int_to_ptr.hbm [resolvable:$true] %s968_s16 }
 0x1da   : > { %545 = vrot.lane.b32.xlu0 %v1192_v7, %s1040_s7  ;;  %s970_s7 = scalar_lea.hbm %s969_s16, 8  ;;  %p975_p12 = scmp.lt.s32.totalorder %s969_s16, %s1280_s5 }
 0x1db   : > { %p971_p1 = scmp.ne.s32.totalorder %s969_s16, %s970_s7  ;;  %p976_p7 = scmp.lt.s32.totalorder %s974_s6, %s970_s7 }
 0x1dd   : > { %p972_p3 = pnand %p971_p1, %p1143_p4  ;;  %p977_p8 = por %p976_p7, %p975_p12 }
 0x1df   : > { %p973_p5 = pneg %p972_p3 }
 0x1e1   : > { %p978_p9 = pnand %p977_p8, %p973_p5 }
 0x22b   : > { %v348_v47 = vpop.xlane.xlu1 %347 }
 0x22c   : > { %v349_v48 = vsub.f32 %v345_v29, %v348_v47 }
 0x22e   : > { %v350_v49 = vmul.f32 1.442695, %v349_v48 }
 0x230   : > { %848 = vpow2.f32 %v350_v49 }
 0x233   : > { %v472_v52 = vpop.xlane.xlu1 %471 }
 0x234   : > { %v473_v55 = vsub.f32 %v469_v34, %v472_v52 }
 0x236   : > { %v849_v50 = vpop.eup %848  ;;  %v474_v57 = vmul.f32 1.442695, %v473_v55 }
 0x237   : > { %v356_v51 = vpack.c.bf16 %v849_v50, %v849_v50  ;;  %v352_v9 = vsel %vm324_vm1, %v849_v50, 0.0 }
 0x239   : > { %739 = vmatmul.msk.bf16.vlgmr.msra.gmra.mxu2 %vm324_vm1, %v356_v51  ;;  %v408_v53 = vpop.xlane.xlu0 %407 }
 0x23a   : > { %v409_v54 = vsub.f32 %v405_v39, %v408_v53 }
 0x23c   : > { %v410_v56 = vmul.f32 1.442695, %v409_v54 }
 0x23e   : > { %850 = vpow2.f32 %v410_v56 }
 0x23f   : > { %852 = vpow2.f32 %v474_v57 }
 0x244   : > { %v851_v58 = vpop.eup %850 }
 0x245   : > { %v412_v59 = vsel %vm324_vm1, %v851_v58, 0.0  ;;  %v416_v60 = vpack.c.bf16 %v851_v58, %v851_v58  ;;  %v853_v62 = vpop.eup %852 }
 0x246   : > { %413 = vadd.xlane.f32.xlu2 %v412_v59  ;;  %v476_v5 = vsel %vm324_vm1, %v853_v62, 0.0  ;;  %v480_v6 = vpack.c.bf16 %v853_v62, %v853_v62 }
 0x249   : > { %v536_v61 = vpop.xlane.xlu2 %535  ;;  %741 = vmatmul.msk.bf16.vlgmr.msrb.gmra.mxu2 %vm324_vm1, %v416_v60 }
 0x24a   : > { %v537_v63 = vsub.f32 %v533_v44, %v536_v61 }
 0x24b   : > { %v482_v0 = vpop.permute.xlu1 %481 }
 0x24c   : > { %v538_v1 = vmul.f32 1.442695, %v537_v63  ;;  %v546_v2 = vpop.permute.xlu0 %545  ;;  %v487_v3 = vsel %vm362_vm2, %v482_v0, 0 }
 0x24d   : > { %v551_v4 = vsel %vm362_vm2, %v546_v2, 0  ;;  %496 = vmatpush.bf16.msrb.mxu1 %v487_v3 }
 0x24e   : > { %854 = vpow2.f32 %v538_v1  ;;  %477 = vadd.xlane.f32.xlu2 %v476_v5  ;;  %560 = vmatpush.bf16.msra.mxu2 %v551_v4 }
 0x250   : > { %743 = vmatmul.msk.bf16.vlgmr.msrb.gmra.mxu1 %vm324_vm1, %v480_v6 }
 0x254   : > { %v855_v7 = vpop.eup %854 }
 0x255   : > { %v540_v8 = vsel %vm324_vm1, %v855_v7, 0.0  ;;  %v544_v10 = vpack.c.bf16 %v855_v7, %v855_v7 }
 0x256   : > { %541 = vadd.xlane.f32.xlu0 %v540_v8  ;;  %353 = vadd.xlane.f32.xlu2 %v352_v9 }
 0x259   : > { %745 = vmatmul.msk.bf16.vlgmr.msra.gmra.mxu2 %vm324_vm1, %v544_v10 }
 0x2b9   : > { %v414_v11 = vpop.xlane.xlu2 %413 }
 0x2ba   : > { %856 = vrcp.f32 %v414_v11 }
 0x2bc   : > { %v375_v12 = vpop.f32.mrf.mxu2 }
 0x2c0   : > { %v857_v16 = vpop.eup %856 }
 0x2c1   : > { %v478_v13 = vpop.xlane.xlu2 %477 }
 0x2c2   : > { %858 = vrcp.f32 %v478_v13 }
 0x2c4   : > { %v377_v14 = vpop.f32.mrf.mxu2 }
 0x2c8   : > { %v859_v18 = vpop.eup %858 }
 0x2c9   : > { %v354_v15 = vpop.xlane.xlu2 %353  ;;  %v542_v24 = vpop.xlane.xlu0 %541 }
 0x2ca   : > { %860 = vrcp.f32 %v354_v15 }
 0x2cb   : > { %862 = vrcp.f32 %v542_v24 }
 0x2cc   : > { %v434_v17 = vpop.f32.mrf.mxu2 }
 0x2cd   : > { %v438_v19 = vmul.f32 %v857_v16, %v434_v17  ;;  %v498_v20 = vpop.f32.mrf.mxu1 }
 0x2ce   : > { %v502_v21 = vmul.f32 %v859_v18, %v498_v20 }
 0x2cf   : > { %440 = vrot.lane.b32.xlu1 %v438_v19, %s1041_s13 }
 0x2d0   : > { %v861_v22 = vpop.eup %860  ;;  %504 = vrot.lane.b32.xlu2 %v502_v21, %s1042_s26 }
 0x2d1   : > { %v379_v23 = vmul.f32 %v861_v22, %v375_v12  ;;  %v863_v27 = vpop.eup %862 }
 0x2d3   : > { %380 = vst.msk [vmem:[#allocation2] sm:$0xff] %vm324_vm1, %v379_v23 }
 0x2d4   : > { %v436_v25 = vpop.f32.mrf.mxu2 }
 0x2d5   : > { %v500_v26 = vpop.f32.mrf.mxu1 }
 0x2dc   : > { %v562_v28 = vpop.f32.mrf.mxu2 }
 0x2dd   : > { %v566_v29 = vmul.f32 %v863_v27, %v562_v28 }
 0x2df   : > { %568 = vrot.lane.b32.xlu1 %v566_v29, %s1043_s8 }
 0x2e4   : > { %v564_v30 = vpop.f32.mrf.mxu2 }
 0x32a   : > { %v505_v34 = vpop.permute.xlu2 %504 }
 0x341   : > { %v441_v33 = vpop.permute.xlu1 %440 }
 0x342   : > { %444 = vst.msk [vmem:[#allocation2] sm:$0xff] %vm443_vm4, %v441_v33 }
 0x343   : > { %508 = vst.msk [vmem:[#allocation2] sm:$0xff] %vm507_vm5, %v505_v34 }
 0x351   : > { %v569_v35 = vpop.permute.xlu1 %568 }
 0x352   : > { %572 = vst.msk [vmem:[#allocation2] sm:$0xff] %vm571_vm6, %v569_v35 }
 0x359   : > { %v573_v36 = vld [vmem:[#allocation2] sm:$0xff] }
 0x35a   : > { %v574_v37 = vpack.c.bf16 %v573_v36, %v573_v36 }
 0x35c   : > { %754 = vmatmul.msk.bf16.vlgmr.msra.gmra.mxu0 %vm298_vm0, %v574_v37 }
 0x3d9   : > { %v607_v39 = vpop.f32.mrf.mxu0 }
 0x3da   : > { %v608_v40 = vadd.f32 %v847_v38, %v607_v39 }
 0x3dc   : > { %611 = vst.msk [vmem:[%s274_s28] sm:$0xff] %vm298_vm0, %v608_v40 }
 0x3dd   : > { %981 = shalt.err (!%p978_p9)
}
 0x3de   : > { %773 = dma.vmem_to_hbm [thread:$0]  (%p1143_p4), %s626_s29, 128, %s628_s30, %s613_s25  }
 0x3e1   : > { %v609_v41 = vpop.f32.mrf.mxu0 }
 0x3e2 PF: > { %s639_s22 = sand.u32 1, %s1012_s18   ;;  %p1287_p10 = scmp.ge.s32.totalorder %s1024_s21, 2 }
 0x3e3   : > { %s640_s9 = scalar_lea.sflag [#allocation5], %s639_s22 }
 0x3e4   : > { %p787_p13 = pnand %p1287_p10, %p1147_p6 }
 0x3e6   : > { %p788_p11 = pneg %p787_p13 }
 0x3e8   : > { %1007 = dma.done.wait (%p788_p11), %s640_s9, 128  }
 0x3e9   : > { %1009 = vsyncadd (%p788_p11), %s640_s9, 4294967168  ;;  %p19_p0 = scmp.ge.s32.totalorder %s1117_s12, 4   ;;  %s1288_s18 = smov %s1016_s19 }
 0x3ea   : > { %s1289_s19 = smov %s1020_s20  ;;  %s1290_s20 = smov %s1128_s15 }
 0x3eb   : > { %s1291_s21 = smov %s1117_s12  ;;  %21 = sbr.rel (!%p19_p0) target bundleno = 6 (0x6), region = 93 }
 0x3f0   :  { %646 = vsyncpa [#allocation4], 1 }
 0x3f1   :  { %648 = vsyncpa [#allocation4 + $0x1], 1 }
 0x3f2   :  { %649 = vsyncpa [#allocation7], 1 }
 0x3f3   :  { %650 = vsyncpa [#allocation5], 1 }
 0x3f4   :  { %652 = vsyncpa [#allocation5 + $0x1], 1 }

</bundles_post_ra>
